<compile_context>
chip_gen: v7x
topology: tpu7x:2x2x1
jax: 0.10.0
libtpu: 0.0.40
codegen_flags: <defaults>
</compile_context>

<pallas_src>
import jax
import jax.numpy as jnp
from jax.experimental import pallas as pl
from jax.experimental.pallas import tpu as pltpu

EPS = 1e-5


def _conv1d_fused_kernel(x_ref, w_ref, b_ref, sel_ref, alpha_ref, out_ref):
    """One batch element: conv (BN pre-folded) -> PReLU -> MaxPool1d(2).

    x_ref    : (1, C, L)            input slab, native dtype
    w_ref    : (K, Cout, C)  bf16   BN-folded conv weight, one tap per k
    b_ref    : (Cout, 1)     f32    BN-folded conv bias
    sel_ref  : (L_out-1, L_pool) f32 constant stride-2 selection matrix
    alpha_ref: (1,)          SMEM   PReLU shared slope
    out_ref  : (1, Cout, L_pool)    output block (PyTorch NCL layout)
    """
    _, C, L = x_ref.shape
    K, Cout, _ = w_ref.shape
    L_out = L - K + 1

    # Single cast of the input slab to the MXU operand dtype (f32 accumulation
    # below keeps the result within test tolerance).
    xb = x_ref[0].astype(jnp.bfloat16)                        # (C, L)

    # --- Conv1d (+ folded BatchNorm): K lane-shifted views, no im2col scratch ---
    acc = jnp.zeros((Cout, L_out), jnp.float32)
    for k in range(K):                                        # K is static & tiny (3)
        acc = acc + jnp.dot(w_ref[k], xb[:, k:k + L_out],
                            preferred_element_type=jnp.float32)
    y = acc + b_ref[...]                                      # (Cout, L_out) f32

    # --- PReLU (shared slope), f32 on the VPU ---
    alpha = alpha_ref[0]
    y = jnp.where(y > 0, y, alpha * y)

    # --- MaxPool1d(kernel=2, stride=2), floor mode ---
    # Pair-max of adjacent lanes (O(L), VPU), then ONE stride-2 compaction
    # matmul against the hoisted constant selector (exact 0/1 in f32).
    z = jnp.maximum(y[:, :L_out - 1], y[:, 1:])               # (Cout, L_out-1)
    pooled = jnp.dot(z, sel_ref[...],
                     preferred_element_type=jnp.float32)      # (Cout, L_pool)

    # Single bulk store, already in PyTorch (Cout, L_pool) orientation.
    out_ref[0] = pooled.astype(out_ref.dtype)


def conv_1d_forward(x_ncl, gamma, beta, weight, bias, alpha):
    """Pallas equivalent of Conv_1D.forward. x_ncl: (N, C_in, L), PyTorch layout."""
    N, C, L = x_ncl.shape
    Cout, Cin, K = weight.shape
    assert Cin == C
    L_out = L - K + 1
    L_pool = L_out // 2

    # --- BatchNorm1d (training-mode batch stats, biased variance): fused f32
    #     reductions (no f32 materialization of x), folded into the conv ---
    mean = jnp.mean(x_ncl, axis=(0, 2), dtype=jnp.float32)            # (C,)
    ex2 = jnp.mean(jnp.square(x_ncl), axis=(0, 2), dtype=jnp.float32) # (C,)
    var = jnp.maximum(ex2 - mean * mean, 0.0)                          # biased
    scale = gamma.astype(jnp.float32) * jax.lax.rsqrt(var + EPS)       # (C,)
    shift = beta.astype(jnp.float32) - mean * scale                    # (C,)

    w32 = weight.astype(jnp.float32)                                   # (Cout, C, K)
    w_eff = w32 * scale[None, :, None]
    b_eff = bias.astype(jnp.float32) + jnp.sum(w32 * shift[None, :, None], axis=(1, 2))
    # (K, Cout, C), bf16 matmul operand (f32 accumulation happens in-kernel).
    w_koc = jnp.transpose(w_eff, (2, 0, 1)).astype(jnp.bfloat16)

    # Constant stride-2 pooling selector, built once here (constant index_map
    # below -> DMA'd into VMEM a single time, never rebuilt per grid step).
    sel = (jnp.arange(L_out - 1)[:, None] == 2 * jnp.arange(L_pool)[None, :]
           ).astype(jnp.float32)                                        # (L_out-1, L_pool)

    flops = N * (2 * Cout * K * C * L_out            # conv
                 + 2 * Cout * (L_out - 1) * L_pool   # pool compaction matmul
                 + 4 * Cout * L_out)                 # PReLU + pair-max
    bytes_accessed = (N * C * L * x_ncl.dtype.itemsize
                      + N * Cout * L_pool * x_ncl.dtype.itemsize
                      + K * Cout * C * 2 + Cout * 4 + (L_out - 1) * L_pool * 4)

    kernel = pl.pallas_call(
        _conv1d_fused_kernel,
        out_shape=jax.ShapeDtypeStruct((N, Cout, L_pool), x_ncl.dtype),
        grid=(N,),
        in_specs=[
            pl.BlockSpec((1, C, L), lambda n: (n, 0, 0)),
            pl.BlockSpec((K, Cout, C), lambda n: (0, 0, 0)),
            pl.BlockSpec((Cout, 1), lambda n: (0, 0)),
            pl.BlockSpec((L_out - 1, L_pool), lambda n: (0, 0)),
            pl.BlockSpec(memory_space=pltpu.MemorySpace.SMEM),
        ],
        out_specs=pl.BlockSpec((1, Cout, L_pool), lambda n: (n, 0, 0)),
        compiler_params=pltpu.CompilerParams(dimension_semantics=("parallel",)),
        cost_estimate=pl.CostEstimate(flops=flops, transcendentals=0,
                                      bytes_accessed=bytes_accessed),
    )
    return kernel(
        x_ncl,                                       # native dtype, native NCL layout
        w_koc,
        b_eff.reshape(Cout, 1),
        sel,
        jnp.asarray(alpha, jnp.float32).reshape(1),
    )


def _reference(x_ncl, gamma, beta, weight, bias, alpha):
    """Pure-JAX reference matching the PyTorch forward (NCL layout)."""
    mean = jnp.mean(x_ncl, axis=(0, 2), keepdims=True)
    var = jnp.mean((x_ncl - mean) ** 2, axis=(0, 2), keepdims=True)
    xbn = (x_ncl - mean) * jax.lax.rsqrt(var + EPS)
    xbn = xbn * gamma.reshape(1, -1, 1) + beta.reshape(1, -1, 1)
    y = jax.lax.conv_general_dilated(
        xbn, weight, window_strides=(1,), padding="VALID",
        dimension_numbers=("NCH", "OIH", "NCH"),
    ) + bias.reshape(1, -1, 1)
    y = jnp.where(y > 0, y, alpha * y)
    n, c, l_out = y.shape
    l_pool = l_out // 2
    return y[..., : 2 * l_pool].reshape(n, c, l_pool, 2).max(axis=-1)


if __name__ == "__main__":
    key = jax.random.PRNGKey(0)
    kx, kw, kb = jax.random.split(key, 3)

    N, Cin, L = 2, 4, 16
    Cout, K = 8, 3

    x = jax.random.normal(kx, (N, Cin, L), dtype=jnp.float32)
    # Deterministic synthetic parameters (module __init__ shapes; PyTorch defaults
    # for gamma/beta/alpha; conv weight/bias drawn from a fixed key).
    weight = jax.random.normal(kw, (Cout, Cin, K), dtype=jnp.float32) * 0.1
    bias = jax.random.normal(kb, (Cout,), dtype=jnp.float32) * 0.1
    gamma = jnp.ones((Cin,), jnp.float32)
    beta = jnp.zeros((Cin,), jnp.float32)
    alpha = jnp.float32(0.25)

    out = conv_1d_forward(x, gamma, beta, weight, bias, alpha)
    out = jax.block_until_ready(out)

    ref = _reference(x, gamma, beta, weight, bias, alpha)
    assert out.shape == ref.shape == (N, Cout, (L - K + 1) // 2), (out.shape, ref.shape)
    assert jnp.allclose(out, ref, atol=1e-2, rtol=1e-2), float(jnp.max(jnp.abs(out - ref)))

    print("KERNEL_OK")
</pallas_src>

<mosaic_0001>
module attributes {stable_mosaic.version = 11 : i64} {
  func.func @_conv1d_fused_kernel(%arg0: i32, %arg1: memref<1x4x16xf32, #tpu.memory_space<vmem>>, %arg2: memref<3x8x4xbf16, #tpu.memory_space<vmem>>, %arg3: memref<8x1xf32, #tpu.memory_space<vmem>>, %arg4: memref<13x7xf32, #tpu.memory_space<vmem>>, %arg5: memref<1xf32, #tpu.memory_space<smem>>, %arg6: memref<1x8x7xf32, #tpu.memory_space<vmem>>) attributes {dimension_semantics = [#tpu.dimension_semantics<parallel>], iteration_bounds = array<i64: 2>, scalar_prefetch = 0 : i64, scratch_operands = 0 : i64, tpu.core_type = #tpu.core_type<tc>, window_params = [{transform_indices = @transform_0, window_bounds = array<i64: 1, 4, 16>}, {pipeline_mode = #tpu.pipeline_mode<synchronous>, transform_indices = @transform_1, window_bounds = array<i64: 3, 8, 4>}, {pipeline_mode = #tpu.pipeline_mode<synchronous>, transform_indices = @transform_2, window_bounds = array<i64: 8, 1>}, {pipeline_mode = #tpu.pipeline_mode<synchronous>, transform_indices = @transform_3, window_bounds = array<i64: 13, 7>}, {transform_indices = @transform_4, window_bounds = array<i64: 1>}, {transform_indices = @transform_5, window_bounds = array<i64: 1, 8, 7>}]} {
    %c0 = arith.constant 0 : index
    %c0_0 = arith.constant 0 : index
    %c0_1 = arith.constant 0 : index
    %0 = vector.load %arg1[%c0, %c0_0, %c0_1] : memref<1x4x16xf32, #tpu.memory_space<vmem>>, vector<1x4x16xf32>
    %1 = vector.shape_cast %0 : vector<1x4x16xf32> to vector<4x16xf32>
    %2 = arith.truncf %1 : vector<4x16xf32> to vector<4x16xbf16>
    %cst = arith.constant 0.000000e+00 : f32
    %3 = vector.broadcast %cst : f32 to vector<8x14xf32>
    %c0_2 = arith.constant 0 : index
    %c0_3 = arith.constant 0 : index
    %c0_4 = arith.constant 0 : index
    %4 = vector.load %arg2[%c0_2, %c0_3, %c0_4] : memref<3x8x4xbf16, #tpu.memory_space<vmem>>, vector<1x8x4xbf16>
    %5 = vector.shape_cast %4 : vector<1x8x4xbf16> to vector<8x4xbf16>
    %6 = vector.extract_strided_slice %2 {offsets = [0, 0], sizes = [4, 14], strides = [1, 1]} : vector<4x16xbf16> to vector<4x14xbf16>
    %cst_5 = arith.constant dense<0.000000e+00> : vector<8x14xf32>
    %7 = tpu.matmul %5, %6, %cst_5 {dimension_numbers = #tpu.dot_dimension_numbers<[1], [0], [0], [1], [0, 0, 1, 1], [], []>} : vector<8x4xbf16>, vector<4x14xbf16>, vector<8x14xf32> -> vector<8x14xf32>
    %8 = arith.addf %3, %7 : vector<8x14xf32>
    %c1 = arith.constant 1 : index
    %c0_6 = arith.constant 0 : index
    %c0_7 = arith.constant 0 : index
    %9 = vector.load %arg2[%c1, %c0_6, %c0_7] : memref<3x8x4xbf16, #tpu.memory_space<vmem>>, vector<1x8x4xbf16>
    %10 = vector.shape_cast %9 : vector<1x8x4xbf16> to vector<8x4xbf16>
    %11 = vector.extract_strided_slice %2 {offsets = [0, 1], sizes = [4, 14], strides = [1, 1]} : vector<4x16xbf16> to vector<4x14xbf16>
    %cst_8 = arith.constant dense<0.000000e+00> : vector<8x14xf32>
    %12 = tpu.matmul %10, %11, %cst_8 {dimension_numbers = #tpu.dot_dimension_numbers<[1], [0], [0], [1], [0, 0, 1, 1], [], []>} : vector<8x4xbf16>, vector<4x14xbf16>, vector<8x14xf32> -> vector<8x14xf32>
    %13 = arith.addf %8, %12 : vector<8x14xf32>
    %c2 = arith.constant 2 : index
    %c0_9 = arith.constant 0 : index
    %c0_10 = arith.constant 0 : index
    %14 = vector.load %arg2[%c2, %c0_9, %c0_10] : memref<3x8x4xbf16, #tpu.memory_space<vmem>>, vector<1x8x4xbf16>
    %15 = vector.shape_cast %14 : vector<1x8x4xbf16> to vector<8x4xbf16>
    %16 = vector.extract_strided_slice %2 {offsets = [0, 2], sizes = [4, 14], strides = [1, 1]} : vector<4x16xbf16> to vector<4x14xbf16>
    %cst_11 = arith.constant dense<0.000000e+00> : vector<8x14xf32>
    %17 = tpu.matmul %15, %16, %cst_11 {dimension_numbers = #tpu.dot_dimension_numbers<[1], [0], [0], [1], [0, 0, 1, 1], [], []>} : vector<8x4xbf16>, vector<4x14xbf16>, vector<8x14xf32> -> vector<8x14xf32>
    %18 = arith.addf %13, %17 : vector<8x14xf32>
    %c0_12 = arith.constant 0 : index
    %c0_13 = arith.constant 0 : index
    %19 = vector.load %arg3[%c0_12, %c0_13] : memref<8x1xf32, #tpu.memory_space<vmem>>, vector<8x1xf32>
    %20 = vector.broadcast %19 : vector<8x1xf32> to vector<8x14xf32>
    %21 = arith.addf %18, %20 : vector<8x14xf32>
    %c0_14 = arith.constant 0 : index
    %22 = memref.load %arg5[%c0_14] : memref<1xf32, #tpu.memory_space<smem>>
    %cst_15 = arith.constant 0.000000e+00 : f32
    %23 = vector.broadcast %cst_15 : f32 to vector<8x14xf32>
    %24 = arith.cmpf ogt, %21, %23 : vector<8x14xf32>
    %25 = vector.broadcast %22 : f32 to vector<8x14xf32>
    %26 = arith.mulf %25, %21 : vector<8x14xf32>
    %27 = arith.select %24, %21, %26 : vector<8x14xi1>, vector<8x14xf32>
    %28 = vector.extract_strided_slice %27 {offsets = [0, 0], sizes = [8, 13], strides = [1, 1]} : vector<8x14xf32> to vector<8x13xf32>
    %29 = vector.extract_strided_slice %27 {offsets = [0, 1], sizes = [8, 13], strides = [1, 1]} : vector<8x14xf32> to vector<8x13xf32>
    %30 = arith.maximumf %28, %29 : vector<8x13xf32>
    %c0_16 = arith.constant 0 : index
    %c0_17 = arith.constant 0 : index
    %31 = vector.load %arg4[%c0_16, %c0_17] : memref<13x7xf32, #tpu.memory_space<vmem>>, vector<13x7xf32>
    %cst_18 = arith.constant dense<0.000000e+00> : vector<8x7xf32>
    %32 = tpu.matmul %30, %31, %cst_18 {dimension_numbers = #tpu.dot_dimension_numbers<[1], [0], [0], [1], [0, 0, 1, 1], [], []>} : vector<8x13xf32>, vector<13x7xf32>, vector<8x7xf32> -> vector<8x7xf32>
    %c0_19 = arith.constant 0 : index
    %c0_20 = arith.constant 0 : index
    %c0_21 = arith.constant 0 : index
    %33 = vector.load %arg6[%c0_19, %c0_20, %c0_21] : memref<1x8x7xf32, #tpu.memory_space<vmem>>, vector<1x8x7xf32>
    %34 = vector.shape_cast %33 : vector<1x8x7xf32> to vector<8x7xf32>
    %35 = vector.shape_cast %32 : vector<8x7xf32> to vector<1x8x7xf32>
    tpu.vector_store %arg6[%c0_19, %c0_20, %c0_21], %35 {strides = array<i32>} : memref<1x8x7xf32, #tpu.memory_space<vmem>>, vector<1x8x7xf32>,
    return
  }
  func.func @transform_0(%arg0: i32) -> (i32, i32, i32) {
    %c0_i32 = arith.constant 0 : i32
    %c0_i32_0 = arith.constant 0 : i32
    %c0_i32_1 = arith.constant 0 : i32
    return %arg0, %c0_i32, %c0_i32_0 : i32, i32, i32
  }
  func.func @transform_1(%arg0: i32) -> (i32, i32, i32) {
    %c0_i32 = arith.constant 0 : i32
    %c0_i32_0 = arith.constant 0 : i32
    %c0_i32_1 = arith.constant 0 : i32
    %c0_i32_2 = arith.constant 0 : i32
    return %c0_i32, %c0_i32_0, %c0_i32_1 : i32, i32, i32
  }
  func.func @transform_2(%arg0: i32) -> (i32, i32) {
    %c0_i32 = arith.constant 0 : i32
    %c0_i32_0 = arith.constant 0 : i32
    %c0_i32_1 = arith.constant 0 : i32
    return %c0_i32, %c0_i32_0 : i32, i32
  }
  func.func @transform_3(%arg0: i32) -> (i32, i32) {
    %c0_i32 = arith.constant 0 : i32
    %c0_i32_0 = arith.constant 0 : i32
    %c0_i32_1 = arith.constant 0 : i32
    return %c0_i32, %c0_i32_0 : i32, i32
  }
  func.func @transform_4(%arg0: i32) -> i32 {
    %c0_i32 = arith.constant 0 : i32
    %c0_i32_0 = arith.constant 0 : i32
    return %c0_i32 : i32
  }
  func.func @transform_5(%arg0: i32) -> (i32, i32, i32) {
    %c0_i32 = arith.constant 0 : i32
    %c0_i32_0 = arith.constant 0 : i32
    %c0_i32_1 = arith.constant 0 : i32
    return %arg0, %c0_i32, %c0_i32_0 : i32, i32, i32
  }
}

</mosaic_0001>

<bundles_post_ra>
// kernel: tpu_custom_call.1
= control target key start
LH: loop header
LB: loop body
LE: loop exit
PB: predicated region body
PF: predicated region fallthrough
CT: control target
= control target key end

     0   :  { %s646_s20 = smov 0   ;;  %s697_s0 = inlined_call_operand.vmem [shape: f32[2,4,16], index: 0, kind: input, shape index: {}]   ;;  %s698_s1 = inlined_call_operand.vmem [shape: bf16[3,8,4], index: 1, kind: input, shape index: {}]   ;;  %s699_s2 = inlined_call_operand.vmem [shape: f32[8,1], index: 2, kind: input, shape index: {}]   ;;  %s700_s3 = inlined_call_operand.vmem [shape: f32[13,7], index: 3, kind: input, shape index: {}]   ;;  %s701_s4 = inlined_call_operand.<no memory space> [shape: f32[1], index: 4, kind: input, shape index: {}]   ;;  %s702_s5 = inlined_call_operand.vmem [shape: f32[2,8,7], index: 5, kind: output, shape index: {}]  }
   0x1   :  { %10 = sst [smem:[#allocation2]] %s701_s4 }
   0x2 LB: > { %s527_s21 = sadd.s32 4294967295, %s604_s20   ;;  %p531_p0 = scmp.ge.s32.totalorder %s604_s20, 1  ;;  %s604_s20 = sphi %s646_s20, %s16_s20  }
   0x3   : > { %p187_p1 = scmp.lt.s32.totalorder %s604_s20, 3 }
   0x5   : > { %p188_p2 = pnand %p531_p0, %p187_p1 }
   0x6   : > { %p213_p3 = scmp.lt.s32.totalorder (!%p188_p2), %s527_s21, 1  ;;  %v606_v0 = vmov (!%p188_p2), 0.0   ;;  %vm607_vm0 = vmmov (!%p188_p2), 0   ;;  %vm234_vm1 = vcmask (!%p188_p2), 1041408   ;;  %v375_v3 = vld [vmem:[%s699_s2] sm:$0xff] (!%p188_p2)  ;;  %s608_s27 = smov (!%p188_p2), 127  }
   0x7   : > { %191 = sbr.rel (%p188_p2) target bundleno = 696 (0x2b8), region = 40  ;;  %552 = vmatprep.subr.bf16.mxu0 (!%p188_p2), %v606_v0  ;;  %558 = vmatprep.subr.bf16.mxu1 (!%p188_p2), %v606_v0  ;;  %v609_v5 = vmov (!%p188_p2), 0   ;;  %vm230_vm2 = vcmask (!%p188_p2), 31744   ;;  %v224_v6 = vld [vmem:[%s698_s1] sm:$0xf] (!%p188_p2)  ;;  %s610_s30 = smov (!%p188_p2), 126  }
   0x8   : > { %554 = vmatprep.mubr.msk.bf16.mxu0 (!%p188_p2), %vm607_vm0, %v606_v0  ;;  %560 = vmatprep.mubr.msk.bf16.mxu1 (!%p188_p2), %vm607_vm0, %v606_v0  ;;  %v534_v9 = vld [vmem:[%s698_s1 + $0x4] sm:$0xf] (!%p188_p2)  ;;  %v537_v12 = vld [vmem:[%s698_s1 + $0x8] sm:$0xf] (!%p188_p2)  ;;  %vm398_vm3 = vcmask (!%p188_p2), 1044480   ;;  %v611_v19 = vmov (!%p188_p2), 0.0|0.0  }
   0x9   : > { %596 = vset.pattern.permute.xlu1 (!%p188_p2), %v609_v5  ;;  %597 = vset.pattern.permute.xlu0 (!%p188_p2), %v609_v5  ;;  %v392_v17 = vld [vmem:[%s700_s3] sm:$0xff] (!%p188_p2)  ;;  %v393_v18 = vld [vmem:[%s700_s3 + $0x8] sm:$0x1f] (!%p188_p2)  ;;  %vm612_vm4 = vmmov (!%p188_p2), 1   ;;  %s382_s14 = sld [smem:[#allocation2]] (!%p188_p2)  ;;  %vm394_vm7 = vcmask (!%p188_p2), 105472  }
   0xa   : > { %378 = vperm.xlu1 (!%p188_p2), %596, %v375_v3   ;;  %v578_v20 = vpack.c.bf16 (!%p188_p2), %v393_v18, %v392_v17  ;;  %vm579_vm5 = vmpackc.low (!%p188_p2), %vm398_vm3, %vm612_vm4  ;;  %vm472_vm8 = vcmask (!%p188_p2), 56320  }
   0xe   : > { %s704_s21 = smov (!%p213_p3, %s527_s21), 1 }
   0xf   : > { %s532_s4 = sshll.u32 %s704_s21, 2  ;;  %v384_v30 = vstv %s382_s14  ;;  %s533_s15 = sshll.u32 %s704_s21, 3 }
  0x10   : > { %s216_s24 = scalar_lea.vmem %s697_s0, %s532_s4  ;;  %s220_s18 = scalar_lea.vmem %s702_s5, %s533_s15 }
  0x11   : > { %v222_v1 = vld [vmem:[%s216_s24] sm:$0xf] }
  0x12   : > { %v223_v2 = vpack.c.bf16 %v222_v1, %v222_v1 }
  0x14   : > { %228 = vrot.lane.b32.xlu0 %v223_v2, %s608_s27  ;;  %v282_v4 = vsel %vm234_vm1, %v223_v2, 0 }
  0x15   : > { %559 = vmatpush3.bf16.msra.mxu1 %v282_v4 }
  0x16   : > { %577 = vmatprep.subr.bf16.mxu1 %v611_v19 }
  0x18   : > { %326 = vrot.lane.b32.xlu0 %v223_v2, %s610_s30  ;;  %561 = vmatmul.mubr.msk.bf16.vlgmr.msra.gmra.mrb[0].mxu1 %vm230_vm2, %v224_v6 }
  0x19   : > { %574 = vmatprep.mubr.msk.f32.mxu1 %vm607_vm0, %v606_v0  ;;  %580 = vmatpush3.bf16.msk.msra.mxu1 %vm579_vm5, %v578_v20 }
  0x86   : > { %v229_v7 = vpop.permute.xlu0 %228 }
  0x87   : > { %v236_v8 = vsel %vm234_vm1, %v229_v7, 0 }
  0x88   : > { %553 = vmatpush3.bf16.msra.mxu0 %v236_v8 }
  0x89   : > { %564 = vmatprep.subr.bf16.mxu0 %v606_v0  ;;  %v379_v27 = vpop.permute.xlu1 %378 }
  0x8a   : > { %v327_v10 = vpop.permute.xlu0 %326 }
  0x8b   : > { %v332_v11 = vsel %vm234_vm1, %v327_v10, 0  ;;  %555 = vmatmul.mubr.msk.bf16.vlgmr.msra.gmra.mrb[0].mxu0 %vm230_vm2, %v534_v9 }
  0x8c   : > { %565 = vmatpush3.bf16.msra.mxu0 %v332_v11  ;;  %566 = vmatprep.mubr.msk.bf16.mxu0 %vm607_vm0, %v606_v0 }
  0x93   : > { %567 = vmatmul.mubr.msk.bf16.vlgmr.msra.gmra.mrb[4].mxu0 %vm230_vm2, %v537_v12 }
  0xeb   : > { %v318_v13 = vpop.f32.mrb[0].mxu1 }
  0xec   : > { %v562_v14 = vpop.f32.mrb[1].mxu1 }
  0xed   : > { %v321_v15 = vpop.f32.mrb[2].mxu1 }
  0xee   : > { %v563_v16 = vpop.f32.mrb[3].mxu1 }
 0x15e   : > { %v272_v21 = vpop.f32.mrb[0].mxu0 }
 0x15f   : > { %v556_v22 = vpop.f32.mrb[1].mxu0  ;;  %v319_v23 = vadd.f32 %v318_v13, %v272_v21 }
 0x160   : > { %v275_v24 = vpop.f32.mrb[2].mxu0 }
 0x161   : > { %v557_v25 = vpop.f32.mrb[3].mxu0 }
 0x166   : > { %v368_v26 = vpop.f32.mrb[4].mxu0 }
 0x167   : > { %v374_v28 = vadd.f32 %v368_v26, %v319_v23  ;;  %v568_v29 = vpop.f32.mrb[5].mxu0 }
 0x168   : > { %v371_v31 = vpop.f32.mrb[6].mxu0 }
 0x169   : > { %v381_v32 = vadd.f32 %v379_v27, %v374_v28  ;;  %v569_v33 = vpop.f32.mrb[7].mxu0 }
 0x16b   : > { %v385_v34 = vmul.f32 %v384_v30, %v381_v32  ;;  %vm383_vm6 = vcmp.gt.f32.partialorder %v381_v32, 0.0 }
 0x16d   : > { %v386_v35 = vsel %vm383_vm6, %v381_v32, %v385_v34 }
 0x16e   : > { %388 = vrot.lane.b32.xlu1 %v386_v35, %s608_s27 }
 0x1e0   : > { %v389_v36 = vpop.permute.xlu1 %388 }
 0x1e1   : > { %v391_v37 = vmax.f32 %v386_v35, %v389_v36 }
 0x1e3   : > { %575 = vmatmul.mubr.msk.f32.vlgmr.msra.gmra.mrb[4].mxu1 %vm394_vm7, %v391_v37 }
 0x2b6   : > { %v468_v38 = vpop.f32.mrb[4].mxu1 }
 0x2b7   : > { %473 = vst.msk [vmem:[%s220_s18] sm:$0xff] %vm472_vm8, %v468_v38  ;;  %v576_v39 = vpop.f32.mrb[5].mxu1 }
 0x2b8 PF: > { %s16_s20 = sadd.s32 1, %s604_s20  }
 0x2b9   : > { %p13_p4 = scmp.ge.s32.totalorder %s16_s20, 4  }
 0x2bb   :  { %15 = sbr.rel (!%p13_p4) target bundleno = 2 (0x2), region = 72 }

</bundles_post_ra>
